<compile_context>
chip_gen: v7x
topology: tpu7x:2x2x1
jax: 0.10.0
libtpu: 0.0.40
codegen_flags: <defaults>
</compile_context>

<pallas_src>
import math
import functools

import jax
import jax.numpy as jnp
import numpy as np
from jax.experimental import pallas as pl
from jax.experimental.pallas import tpu as pltpu


def _waa_kernel(x_ref, wt_ref, b_ref, o_ref, *, mm_dtype):
    # x_ref: (TB, S, E); wt_ref: (E, 2E) [q-half pre-scaled by 1/sqrt(E)];
    # b_ref: (1, 2E);    o_ref: (TB, E)
    tb, s, e = x_ref.shape
    x_f32 = x_ref[...].astype(jnp.float32)                     # (TB, S, E)
    x_mm = x_f32.astype(mm_dtype)

    # Fused q/k projection: single MXU matmul on the flattened (TB*S, E) slab.
    qk = jax.lax.dot_general(
        x_mm.reshape(tb * s, e), wt_ref[...],
        dimension_numbers=(((1,), (0,)), ((), ())),
        preferred_element_type=jnp.float32,
    ) + b_ref[...]                                              # (TB*S, 2E)

    q = qk[:, :e].reshape(tb, s, e).astype(mm_dtype)            # scale already folded in
    k = qk[:, e:].reshape(tb, s, e).astype(mm_dtype)

    # logits[b, i, j] = q[b, i, :] . k[b, j, :]  (batched, contract last dims;
    # no transposed operand is materialized).
    logits = jax.lax.dot_general(
        q, k,
        dimension_numbers=(((2,), (2,)), ((0,), (0,))),
        preferred_element_type=jnp.float32,
    )                                                           # (TB, S, S)

    # Row softmax in f32; reciprocal of the normalizer goes to the EUP slot.
    m = jnp.max(logits, axis=-1, keepdims=True)
    p = jnp.exp(logits - m)
    recip = pl.reciprocal(jnp.sum(p, axis=-1, keepdims=True), approx=True)

    # sum_q(attn @ v) == (sum_q attn) @ v: build column weights, then a VPU
    # weighted sum over the sequence axis (v == x).
    colw = jnp.sum(p * recip, axis=1)                           # (TB, S)
    out = jnp.sum(colw[..., None] * x_f32, axis=1)              # (TB, E)
    o_ref[...] = out.astype(o_ref.dtype)


def _pick_batch_block(B, S, E, budget_bytes=8 << 20):
    """Largest batch block whose rough f32 working set fits a modest VMEM budget."""
    per_batch = 4 * (3 * S * E + 2 * S * S + E)
    cap = max(1, budget_bytes // max(per_batch, 1))
    if B <= cap:
        return B
    for tb in range(min(cap, B), 0, -1):
        # keep the (TB, E) output block sublane-friendly and a divisor of B
        if B % tb == 0 and (tb % 8 == 0 or tb == 1):
            return tb
    return 1


def weighted_average_attention(x, w_qk, b_qk, *, batch_block=None,
                               matmul_dtype=None, interpret=False):
    """x: (B, S, E); w_qk: (2E, E); b_qk: (2E,). Returns (B, E)."""
    B, S, E = x.shape
    assert w_qk.shape == (2 * E, E) and b_qk.shape == (2 * E,)
    mm_dtype = jnp.dtype(matmul_dtype) if matmul_dtype is not None else jnp.float32

    # Host-side prep: fuse q/k halves into one pre-transposed (E, 2E) weight
    # and fold the 1/sqrt(E) attention scale into the q-half (and its bias).
    scale = 1.0 / math.sqrt(E)
    wt = jnp.concatenate([(w_qk[:E] * scale).T, w_qk[E:].T], axis=1)   # (E, 2E)
    wt = wt.astype(mm_dtype)
    bias = jnp.concatenate([b_qk[:E] * scale, b_qk[E:]]).reshape(1, 2 * E)
    bias = bias.astype(jnp.float32)

    tb = batch_block if batch_block is not None else _pick_batch_block(B, S, E)
    assert B % tb == 0, "batch_block must divide the batch size"

    kernel = functools.partial(_waa_kernel, mm_dtype=mm_dtype)
    return pl.pallas_call(
        kernel,
        out_shape=jax.ShapeDtypeStruct((B, E), x.dtype),
        grid_spec=pltpu.PrefetchScalarGridSpec(
            num_scalar_prefetch=0,
            grid=(B // tb,),
            in_specs=[
                pl.BlockSpec((tb, S, E), lambda b: (b, 0, 0)),   # x (TB batches/step)
                pl.BlockSpec((E, 2 * E), lambda b: (0, 0)),      # fused W_qk^T
                pl.BlockSpec((1, 2 * E), lambda b: (0, 0)),      # fused bias
            ],
            out_specs=pl.BlockSpec((tb, E), lambda b: (b, 0)),   # dense (TB, E) slab
        ),
        compiler_params=pltpu.CompilerParams(
            dimension_semantics=("parallel",),          # shards across TCs on v7x
            vmem_limit_bytes=32 * 1024 * 1024,
        ),
        interpret=interpret,
    )(x, wt, bias)


def _reference(x, w_qk, b_qk):
    """Pure-JAX reference mirroring the PyTorch forward (return_attention=False)."""
    B, S, E = x.shape
    qk = jnp.einsum("bse,fe->bsf", x, w_qk) + b_qk           # (B, S, 2E)
    q, k = qk[..., :E], qk[..., E:]
    logits = jnp.einsum("bqe,bke->bqk", q, k) / np.sqrt(E)
    attn = jax.nn.softmax(logits, axis=-1)
    values = jnp.einsum("bqk,bke->bqe", attn, x)
    return jnp.sum(values, axis=1)                            # (B, E)


if __name__ == "__main__":
    B, S, E = 2, 8, 32

    key = jax.random.PRNGKey(0)
    kx, kw = jax.random.split(key)

    x = jax.random.normal(kx, (B, S, E), dtype=jnp.float32)

    # Deterministic params matching the module's _reset_parameters:
    # xavier_uniform on qk_proj.weight (shape (2E, E)), bias filled with 0.
    fan_in, fan_out = E, 2 * E
    bound = math.sqrt(6.0 / (fan_in + fan_out))
    w_qk = jax.random.uniform(kw, (2 * E, E), dtype=jnp.float32,
                              minval=-bound, maxval=bound)
    b_qk = jnp.zeros((2 * E,), dtype=jnp.float32)

    ref = _reference(x, w_qk, b_qk)

    # f32 MXU path (approx reciprocal in the softmax -> slightly loosened tol).
    out = jax.block_until_ready(weighted_average_attention(x, w_qk, b_qk))
    np.testing.assert_allclose(np.asarray(out), np.asarray(ref),
                               rtol=1e-2, atol=1e-2)

    # bf16 MXU-operand path (f32 accumulation + f32 softmax): smoke check.
    out_bf16 = jax.block_until_ready(
        weighted_average_attention(x, w_qk, b_qk, matmul_dtype=jnp.bfloat16))
    np.testing.assert_allclose(np.asarray(out_bf16), np.asarray(ref),
                               rtol=1e-1, atol=1e-1)

    print("KERNEL_OK")
</pallas_src>

<mosaic_0001>
module attributes {stable_mosaic.version = 11 : i64} {
  func.func @_waa_kernel(%arg0: i32, %arg1: memref<2x8x32xf32, #tpu.memory_space<vmem>>, %arg2: memref<32x64xf32, #tpu.memory_space<vmem>>, %arg3: memref<1x64xf32, #tpu.memory_space<vmem>>, %arg4: memref<2x32xf32, #tpu.memory_space<vmem>>) attributes {dimension_semantics = [#tpu.dimension_semantics<parallel>], iteration_bounds = array<i64: 1>, scalar_prefetch = 0 : i64, scratch_operands = 0 : i64, tpu.core_type = #tpu.core_type<tc>, window_params = [{transform_indices = @transform_0, window_bounds = array<i64: 2, 8, 32>}, {pipeline_mode = #tpu.pipeline_mode<synchronous>, transform_indices = @transform_1, window_bounds = array<i64: 32, 64>}, {pipeline_mode = #tpu.pipeline_mode<synchronous>, transform_indices = @transform_2, window_bounds = array<i64: 1, 64>}, {transform_indices = @transform_3, window_bounds = array<i64: 2, 32>}]} {
    %c0 = arith.constant 0 : index
    %c0_0 = arith.constant 0 : index
    %c0_1 = arith.constant 0 : index
    %0 = vector.load %arg1[%c0, %c0_0, %c0_1] : memref<2x8x32xf32, #tpu.memory_space<vmem>>, vector<2x8x32xf32>
    %1 = vector.shape_cast %0 : vector<2x8x32xf32> to vector<16x32xf32>
    %c0_2 = arith.constant 0 : index
    %c0_3 = arith.constant 0 : index
    %2 = vector.load %arg2[%c0_2, %c0_3] : memref<32x64xf32, #tpu.memory_space<vmem>>, vector<32x64xf32>
    %cst = arith.constant dense<0.000000e+00> : vector<16x64xf32>
    %3 = tpu.matmul %1, %2, %cst {dimension_numbers = #tpu.dot_dimension_numbers<[1], [0], [0], [1], [0, 0, 1, 1], [], []>} : vector<16x32xf32>, vector<32x64xf32>, vector<16x64xf32> -> vector<16x64xf32>
    %c0_4 = arith.constant 0 : index
    %c0_5 = arith.constant 0 : index
    %4 = vector.load %arg3[%c0_4, %c0_5] : memref<1x64xf32, #tpu.memory_space<vmem>>, vector<1x64xf32>
    %5 = vector.broadcast %4 : vector<1x64xf32> to vector<16x64xf32>
    %6 = arith.addf %3, %5 : vector<16x64xf32>
    %7 = vector.extract_strided_slice %6 {offsets = [0, 0], sizes = [16, 32], strides = [1, 1]} : vector<16x64xf32> to vector<16x32xf32>
    %8 = vector.shape_cast %7 : vector<16x32xf32> to vector<2x8x32xf32>
    %9 = vector.extract_strided_slice %6 {offsets = [0, 32], sizes = [16, 32], strides = [1, 1]} : vector<16x64xf32> to vector<16x32xf32>
    %10 = vector.shape_cast %9 : vector<16x32xf32> to vector<2x8x32xf32>
    %cst_6 = arith.constant dense<0.000000e+00> : vector<2x8x8xf32>
    %11 = tpu.matmul %8, %10, %cst_6 {dimension_numbers = #tpu.dot_dimension_numbers<[2], [2], [1], [1], [0, 0, 0, 1, 1, 1], [0], [0]>} : vector<2x8x32xf32>, vector<2x8x32xf32>, vector<2x8x8xf32> -> vector<2x8x8xf32>
    %cst_7 = arith.constant dense<0xFF800000> : vector<2x8xf32>
    %12 = vector.multi_reduction <maximumf>, %11, %cst_7 [2] : vector<2x8x8xf32> to vector<2x8xf32>
    %13 = vector.shape_cast %12 : vector<2x8xf32> to vector<2x8x1xf32>
    %14 = vector.broadcast %13 : vector<2x8x1xf32> to vector<2x8x8xf32>
    %15 = arith.subf %11, %14 : vector<2x8x8xf32>
    %16 = math.exp %15 : vector<2x8x8xf32>
    %cst_8 = arith.constant dense<0.000000e+00> : vector<2x8xf32>
    %17 = vector.multi_reduction <add>, %16, %cst_8 [2] : vector<2x8x8xf32> to vector<2x8xf32>
    %18 = vector.shape_cast %17 : vector<2x8xf32> to vector<2x8x1xf32>
    %19 = tpu.reciprocal %18 {approx = true} : vector<2x8x1xf32> -> vector<2x8x1xf32>
    %20 = vector.broadcast %19 : vector<2x8x1xf32> to vector<2x8x8xf32>
    %21 = arith.mulf %16, %20 : vector<2x8x8xf32>
    %cst_9 = arith.constant dense<0.000000e+00> : vector<2x8xf32>
    %22 = vector.multi_reduction <add>, %21, %cst_9 [1] : vector<2x8x8xf32> to vector<2x8xf32>
    %23 = vector.shape_cast %22 : vector<2x8xf32> to vector<2x8x1xf32>
    %24 = vector.broadcast %23 : vector<2x8x1xf32> to vector<2x8x32xf32>
    %25 = arith.mulf %24, %0 : vector<2x8x32xf32>
    %cst_10 = arith.constant dense<0.000000e+00> : vector<2x32xf32>
    %26 = vector.multi_reduction <add>, %25, %cst_10 [1] : vector<2x8x32xf32> to vector<2x32xf32>
    %c0_11 = arith.constant 0 : index
    %c0_12 = arith.constant 0 : index
    %27 = vector.load %arg4[%c0_11, %c0_12] : memref<2x32xf32, #tpu.memory_space<vmem>>, vector<2x32xf32>
    tpu.vector_store %arg4[%c0_11, %c0_12], %26 {strides = array<i32>} : memref<2x32xf32, #tpu.memory_space<vmem>>, vector<2x32xf32>,
    return
  }
  func.func @transform_0(%arg0: i32) -> (i32, i32, i32) {
    %c0_i32 = arith.constant 0 : i32
    %c0_i32_0 = arith.constant 0 : i32
    %c0_i32_1 = arith.constant 0 : i32
    return %arg0, %c0_i32, %c0_i32_0 : i32, i32, i32
  }
  func.func @transform_1(%arg0: i32) -> (i32, i32) {
    %c0_i32 = arith.constant 0 : i32
    %c0_i32_0 = arith.constant 0 : i32
    %c0_i32_1 = arith.constant 0 : i32
    return %c0_i32, %c0_i32_0 : i32, i32
  }
  func.func @transform_2(%arg0: i32) -> (i32, i32) {
    %c0_i32 = arith.constant 0 : i32
    %c0_i32_0 = arith.constant 0 : i32
    %c0_i32_1 = arith.constant 0 : i32
    return %c0_i32, %c0_i32_0 : i32, i32
  }
  func.func @transform_3(%arg0: i32) -> (i32, i32) {
    %c0_i32 = arith.constant 0 : i32
    %c0_i32_0 = arith.constant 0 : i32
    return %arg0, %c0_i32 : i32, i32
  }
}

</mosaic_0001>

<bundles_post_ra>
// kernel: tpu_custom_call.1
= control target key start
LH: loop header
LB: loop body
LE: loop exit
PB: predicated region body
PF: predicated region fallthrough
CT: control target
= control target key end

     0   :  { %8 = vsyncpa [#allocation3], 0  ;;  %s599_s0 = inlined_call_operand.hbm [shape: f32[2,8,32], index: 0, kind: input, shape index: {}]   ;;  %s600_s1 = inlined_call_operand.hbm [shape: f32[32,64], index: 1, kind: input, shape index: {}]   ;;  %s601_s2 = inlined_call_operand.vmem [shape: f32[1,64], index: 2, kind: input, shape index: {}]   ;;  %s602_s3 = inlined_call_operand.hbm [shape: f32[2,32], index: 3, kind: output, shape index: {}]  }
   0x1   :  { %9 = vsyncpa [#allocation6], 0 }
   0x2   :  { %10 = vsyncpa [#allocation4], 0  ;;  %s508_s12 = smov [#allocation2]   ;;  %s436_s16 = scalar_lea.hbm %s599_s0, 256 }
   0x3   :  { %s16_s13 = sshll.u32 %s508_s12, 4  ;;  %p437_p0 = scmp.ne.s32.totalorder %s599_s0, %s436_s16  ;;  %s17_s13 = int_to_ptr.vmem [resolvable:$true] %s16_s13 }
   0x4   :  { %p440_p1 = scmp.lt.u32.totalorder %s436_s16, %s599_s0 }
   0x6   :  { %p442_p2 = pnand %p440_p1, %p437_p0 }
   0x8   :  { %445 = shalt.err (!%p442_p2)
}
   0x9   :  { %s446_s21 = scalar_lea.vmem %s17_s13, 256  ;;  %p451_p4 = scmp.lt.s32.totalorder %s17_s13, %s17_s13 }
   0xa   :  { %p447_p3 = scmp.ne.s32.totalorder %s17_s13, %s446_s21  ;;  %p452_p5 = scmp.lt.s32.totalorder %s446_s21, %s446_s21 }
   0xc   :  { %p453_p6 = por %p452_p5, %p451_p4 }
   0xe   :  { %p454_p7 = pnand %p453_p6, %p447_p3 }
  0x10   :  { %457 = shalt.err (!%p454_p7)
}
  0x11   :  { %s509_s22 = smov 128   ;;  %s510_s23 = smov 8  }
  0x12   :  { %22 = dma.hbm_to_vmem [thread:$0]  %s599_s0, 256, %s17_s13, [#allocation3], %s509_s22, %s509_s22, %s510_s23  }
  0x13   :  { %s511_s26 = smov [#allocation5]   ;;  %s458_s30 = scalar_lea.hbm %s600_s1, 512 }
  0x14   :  { %s28_s27 = sshll.u32 %s511_s26, 4  ;;  %p459_p8 = scmp.ne.s32.totalorder %s600_s1, %s458_s30  ;;  %s29_s27 = int_to_ptr.vmem [resolvable:$true] %s28_s27 }
  0x15   :  { %p462_p9 = scmp.lt.u32.totalorder %s458_s30, %s600_s1 }
  0x17   :  { %p464_p10 = pnand %p462_p9, %p459_p8 }
  0x19   :  { %467 = shalt.err (!%p464_p10)
}
  0x1a   :  { %s468_s8 = scalar_lea.vmem %s29_s27, 512  ;;  %p473_p12 = scmp.lt.s32.totalorder %s29_s27, %s29_s27 }
  0x1b   :  { %p469_p11 = scmp.ne.s32.totalorder %s29_s27, %s468_s8  ;;  %p474_p13 = scmp.lt.s32.totalorder %s468_s8, %s468_s8 }
  0x1d   :  { %p475_p0 = por %p474_p13, %p473_p12 }
  0x1f   :  { %p476_p1 = pnand %p475_p0, %p469_p11 }
  0x21   :  { %479 = shalt.err (!%p476_p1)
}
  0x22   :  { %34 = dma.hbm_to_vmem [thread:$0]  %s600_s1, 512, %s29_s27, [#allocation6], %s509_s22, %s509_s22, %s510_s23  }
  0x23   :  { %502 = dma.done.wait [#allocation3], 256  }
  0x24   :  { %503 = vsyncadd [#allocation3], 4294967040 }
  0x25   :  { %504 = dma.done.wait [#allocation6], 512  }
  0x26   :  { %505 = vsyncadd [#allocation6], 4294966784  ;;  %vm56_vm0 = vcmask 261120   ;;  %v45_v0 = vld [vmem:[#allocation5] sm:$0xff]  ;;  %v46_v1 = vld [vmem:[#allocation5 + $0x8] sm:$0xff]  ;;  %v512_v8 = vmov 0.0  }
  0x27   :  { %v47_v2 = vld [vmem:[#allocation5 + $0x10] sm:$0xff]  ;;  %v412_v3 = vpack.c.bf16 %v46_v1, %v45_v0  ;;  %v48_v4 = vld [vmem:[#allocation5 + $0x18] sm:$0xff]  ;;  %402 = vmatprep.subr.mxu1 %v512_v8  ;;  %vm513_vm1 = vmmov 0   ;;  %s514_s11 = smov 96   ;;  %vm292_vm2 = vcmask 64512   ;;  %vm353_vm3 = vcmask 1041409  }
  0x28   :  { %v560_v5 = vld [vmem:[#allocation2] sm:$0xff]  ;;  %v416_v6 = vpack.c.bf16 %v48_v4, %v47_v2  ;;  %v564_v7 = vld [vmem:[#allocation2 + $0x8] sm:$0xff]  ;;  %404 = vmatprep.mubr.msk.f32.mxu1 %vm513_vm1, %v512_v8  ;;  %vm356_vm4 = vcmask 254976  }
  0x29   :  { %399 = vmatprep.mubr.msk.f32.mxu0 %vm56_vm0, %v560_v5  ;;  %413 = vmatprep.subr.bf16.mxu0 %v412_v3  ;;  %v374_v9 = vld [vmem:[%s601_s2] ss:$0 sm:$0xff]  ;;  %s515_s2 = smov [#allocation7]  }
  0x2a   :  { %415 = vmatpush3.bf16.msra.mxu0 %v412_v3  ;;  %s364_s12 = sshll.u32 %s515_s2, 4  ;;  %s365_s12 = int_to_ptr.vmem [resolvable:$true] %s364_s12 }
  0x2b   :  { %417 = vmatprep.subr.bf16.mxu0 %v416_v6  ;;  %s480_s13 = scalar_lea.vmem %s365_s12, 32  ;;  %p485_p3 = scmp.lt.s32.totalorder %s365_s12, %s365_s12 }
  0x2c   :  { %p481_p2 = scmp.ne.s32.totalorder %s365_s12, %s480_s13  ;;  %p486_p4 = scmp.lt.s32.totalorder %s480_s13, %s480_s13 }
  0x2e   :  { %419 = vmatpush3.bf16.msra.mxu0 %v416_v6  ;;  %p487_p5 = por %p486_p4, %p485_p3 }
  0x30   :  { %p488_p6 = pnand %p487_p5, %p481_p2 }
  0x31   :  { %400 = vmatmul.mubr.msk.f32.vlgmr.msra.gmra.mrb[0].mxu0 %vm56_vm0, %v564_v7 }
 0x104   :  { %v401_v10 = vpop.f32.mrb[0].mxu0 }
 0x105   :  { %v129_v11 = vpop.f32.mrb[1].mxu0  ;;  %v135_v13 = vadd.f32 %v401_v10, %v374_v9 }
 0x106   :  { %v130_v12 = vadd.f32 %v374_v9, %v129_v11 }
 0x108   :  { %139 = vrot.lane.b32.xlu0 %v130_v12, %s514_s11 }
 0x10c   :  { %216 = vrot.lane.b32.xlu0 %v135_v13, %s514_s11 }
 0x17a   :  { %v140_v14 = vpop.permute.xlu0 %139 }
 0x17b   :  { %403 = vmatpush3.xpose.msk.msra.mxu1 %vm56_vm0, %v140_v14 }
 0x17c   :  { %407 = vmatprep.subr.mxu1 %v512_v8 }
 0x17e   :  { %405 = vmatmul.mubr.msk.f32.vlgmr.msra.gmra.mrb[0].mxu1 %vm56_vm0, %v130_v12  ;;  %v217_v15 = vpop.permute.xlu0 %216 }
 0x17f   :  { %408 = vmatpush3.xpose.msk.msra.mxu1 %vm56_vm0, %v217_v15  ;;  %409 = vmatprep.mubr.msk.f32.mxu1 %vm513_vm1, %v512_v8 }
 0x182   :  { %410 = vmatmul.mubr.msk.f32.vlgmr.msra.gmra.mrb[2].mxu1 %vm56_vm0, %v135_v13 }
 0x251   :  { %v211_v16 = vpop.f32.mrb[0].mxu1 }
 0x252   :  { %v406_v17 = vpop.f32.mrb[1].mxu1  ;;  %v293_v18 = vsel %vm292_vm2, %v211_v16, -inf }
 0x253   :  { %294 = vmax.xlane.f32.xlu1 %v293_v18 }
 0x255   :  { %v288_v19 = vpop.f32.mrb[2].mxu1 }
 0x256   :  { %v411_v20 = vpop.f32.mrb[3].mxu1  ;;  %v296_v21 = vsel %vm292_vm2, %v288_v19, -inf }
 0x257   :  { %297 = vmax.xlane.f32.xlu1 %v296_v21 }
 0x2e0   :  { %v295_v22 = vpop.xlane.xlu1 %294 }
 0x2e1   :  { %v299_v23 = vsub.f32 %v211_v16, %v295_v22 }
 0x2e3   :  { %v301_v24 = vmul.f32 1.442695, %v299_v23 }
 0x2e4   :  { %v298_v25 = vpop.xlane.xlu1 %297 }
 0x2e5   :  { %428 = vpow2.f32 %v301_v24  ;;  %v300_v26 = vsub.f32 %v288_v19, %v298_v25 }
 0x2e7   :  { %v303_v27 = vmul.f32 1.442695, %v300_v26 }
 0x2e9   :  { %430 = vpow2.f32 %v303_v27 }
 0x2ef   :  { %v429_v28 = vpop.eup %428 }
 0x2f0   :  { %v305_v29 = vsel %vm292_vm2, %v429_v28, 0.0 }
 0x2f1   :  { %306 = vadd.xlane.f32.xlu0 %v305_v29 }
 0x2f3   :  { %v431_v30 = vpop.eup %430 }
 0x2f4   :  { %v308_v31 = vsel %vm292_vm2, %v431_v30, 0.0 }
 0x2f5   :  { %309 = vadd.xlane.f32.xlu1 %v308_v31 }
 0x37e   :  { %v307_v32 = vpop.xlane.xlu0 %306 }
 0x37f   :  { %432 = vrcp.f32 %v307_v32 }
 0x382   :  { %v310_v33 = vpop.xlane.xlu1 %309 }
 0x383   :  { %434 = vrcp.f32 %v310_v33 }
 0x389   :  { %v433_v34 = vpop.eup %432 }
 0x38a   :  { %v313_v35 = vmul.f32 %v433_v34, %v429_v28 }
 0x38c   :  { %v315_v36 = vsel %vm292_vm2, %v313_v35, 0.0 }
 0x38d   :  { %v435_v37 = vpop.eup %434  ;;  %v316_v38 = vrot.slane %v315_v36, 4 }
 0x38e   :  { %v314_v39 = vmul.f32 %v435_v37, %v431_v30 }
 0x38f   :  { %v317_v40 = vadd.f32 %v316_v38, %v315_v36 }
 0x390   :  { %v322_v41 = vsel %vm292_vm2, %v314_v39, 0.0 }
 0x391   :  { %v318_v42 = vrot.slane %v317_v40, 2  ;;  %v323_v43 = vrot.slane %v322_v41, 4 }
 0x393   :  { %v319_v44 = vadd.f32 %v318_v42, %v317_v40  ;;  %v324_v45 = vadd.f32 %v323_v43, %v322_v41 }
 0x395   :  { %v320_v46 = vrot.slane %v319_v44, 1  ;;  %v325_v47 = vrot.slane %v324_v45, 2 }
 0x397   :  { %v321_v48 = vadd.f32 %v320_v46, %v319_v44  ;;  %v326_v49 = vadd.f32 %v325_v47, %v324_v45 }
 0x399   :  { %330 = vbcast.lane.b32.xlu1 %v321_v48, 256  ;;  %v327_v50 = vrot.slane %v326_v49, 1 }
 0x39b   :  { %v328_v51 = vadd.f32 %v327_v50, %v326_v49 }
 0x39d   :  { %333 = vbcast.lane.b32.xlu1 %v328_v51, 256 }
 0x40b   :  { %v331_v52 = vpop.permute.xlu1 %330 }
 0x40c   :  { %v335_v53 = vmul.f32 %v331_v52, %v560_v5 }
 0x40e   :  { %v337_v54 = vsel %vm56_vm0, %v335_v53, 0.0 }
 0x40f   :  { %v338_v55 = vrot.slane %v337_v54, 4  ;;  %v334_v56 = vpop.permute.xlu1 %333 }
 0x410   :  { %v336_v57 = vmul.f32 %v334_v56, %v564_v7 }
 0x411   :  { %v339_v58 = vadd.f32 %v338_v55, %v337_v54 }
 0x412   :  { %v344_v59 = vsel %vm56_vm0, %v336_v57, 0.0 }
 0x413   :  { %v340_v60 = vrot.slane %v339_v58, 2  ;;  %v345_v61 = vrot.slane %v344_v59, 4 }
 0x415   :  { %v341_v62 = vadd.f32 %v340_v60, %v339_v58  ;;  %v346_v63 = vadd.f32 %v345_v61, %v344_v59 }
 0x417   :  { %v347_v0 = vrot.slane %v346_v63, 2  ;;  %v342_v1 = vrot.slane %v341_v62, 1 }
 0x419   :  { %v348_v2 = vadd.f32 %v347_v0, %v346_v63  ;;  %v343_v4 = vadd.f32 %v342_v1, %v341_v62 }
 0x41b   :  { %v349_v3 = vrot.slane %v348_v2, 1 }
 0x41d   :  { %v350_v5 = vadd.f32 %v349_v3, %v348_v2 }
 0x41f   :  { %v354_v6 = vsel %vm353_vm3, %v350_v5, %v343_v4 }
 0x420   :  { %357 = vst.msk [vmem:[#allocation7] sm:$0x3] %vm356_vm4, %v354_v6 }
 0x421   :  { %491 = shalt.err (!%p488_p6)
}
 0x422   :  { %s492_s16 = scalar_lea.hbm %s602_s3, 32 }
 0x423   :  { %p493_p7 = scmp.ne.s32.totalorder %s602_s3, %s492_s16  ;;  %p496_p8 = scmp.lt.u32.totalorder %s492_s16, %s602_s3 }
 0x425   :  { %p498_p9 = pnand %p496_p8, %p493_p7 }
 0x427   :  { %501 = shalt.err (!%p498_p9)
}
 0x428   :  { %367 = dma.vmem_to_hbm [thread:$0]  %s365_s12, 32, %s602_s3, [#allocation4]  }
 0x429   :  { %506 = dma.done.wait [#allocation4], 32  }
 0x42a   :  { %507 = vsyncadd [#allocation4], 4294967264 }
 0x42b   :  { %371 = vsyncpa [#allocation3], 1 }
 0x42c   :  { %372 = vsyncpa [#allocation6], 1 }
 0x42d   :  { %373 = vsyncpa [#allocation4], 1 }

</bundles_post_ra>
